<compile_context>
chip_gen: v5e
topology: v5e:2x2
jax: 0.10.0
libtpu: 0.0.40
codegen_flags: <defaults>
</compile_context>

<pallas_src>
import jax
import jax.numpy as jnp
from jax.experimental import pallas as pl
from jax.experimental.pallas import tpu as pltpu

BN_EPS = 1e-5
LANES = 128


def _round_up_lanes(n):
    return max(LANES, ((n + LANES - 1) // LANES) * LANES)


def _bn_fold(h, gamma, beta, mu=None):
    """Training-mode BatchNorm1d folded into a centered per-feature FMA."""
    if mu is None:
        mu = jnp.mean(h, axis=0, keepdims=True)
    hc = h - mu
    var = jnp.mean(hc * hc, axis=0, keepdims=True)      # two-pass (centered) variance
    scale = jax.lax.rsqrt(var + BN_EPS) * gamma          # (1, P)
    return hc * scale + beta


def mlp_kernel(x_ref, w0_ref, w12_ref, vec_ref, o_ref):
    # x_ref: (B, D0)   w0_ref: (D0, P)   w12_ref: (2, P, P)   vec_ref: (5, P)
    x = x_ref[...]
    w0 = w0_ref[...]
    g0, be0 = vec_ref[0:1, :], vec_ref[1:2, :]
    g1, be1 = vec_ref[2:3, :], vec_ref[3:4, :]
    b2 = vec_ref[4:5, :]

    # Layer 0: Linear (bias cancels under training-mode BN) -> BN -> ReLU.
    h = jnp.dot(x, w0, preferred_element_type=jnp.float32)
    # Batch mean via mean(x) @ w0 == mean(x @ w0): keeps the reduction off the
    # serial dot->reduce chain and puts the (1,D0)x(D0,P) matmul on the MXU.
    mu0 = jnp.dot(jnp.mean(x, axis=0, keepdims=True), w0,
                  preferred_element_type=jnp.float32)
    h = _bn_fold(h, g0, be0, mu=mu0)
    h = jnp.maximum(h, 0.0)

    # Layer 1: Linear (bias cancels under BN) -> BN -> Sigmoid.
    h = jnp.dot(h, w12_ref[0], preferred_element_type=jnp.float32)
    h = _bn_fold(h, g1, be1)
    h = jax.nn.sigmoid(h)

    # Classifier head: Linear(D2, C), lane-dense padded (B, P) store.
    o_ref[...] = (jnp.dot(h, w12_ref[1], preferred_element_type=jnp.float32)
                  + b2).astype(o_ref.dtype)


def prepare_packed_params(p):
    """Zero-pad every feature dim to a common 128-lane multiple P and pack.

    Returns {"w0": (D0,P), "w12": (2,P,P), "vec": (5,P)}.
    b0/b1 are dropped (they cancel under training-mode BN).
    """
    D0, D1 = p["w0"].shape
    D2 = p["w1"].shape[1]
    C = p["w2"].shape[1]
    P = _round_up_lanes(max(D1, D2, C))

    w0 = jnp.pad(p["w0"], ((0, 0), (0, P - D1)))
    w1 = jnp.pad(p["w1"], ((0, P - D1), (0, P - D2)))
    w2 = jnp.pad(p["w2"], ((0, P - D2), (0, P - C)))
    w12 = jnp.stack([w1, w2])                       # (2, P, P)

    def padv(v, n):
        return jnp.pad(v, ((0, 0), (0, P - n)))

    vec = jnp.concatenate([padv(p["g0"], D1), padv(p["be0"], D1),
                           padv(p["g1"], D2), padv(p["be1"], D2),
                           padv(p["b2"], C)], axis=0)   # (5, P)

    # Padded-lane correctness invariants (silent-breakage guard):
    #  - gamma/beta padded lanes must be zero so padded BN lanes stay zero,
    #  - w2 rows beyond D2 must be zero so sigmoid(0)=0.5 in padded lanes is
    #    annihilated by the head matmul.
    assert bool(jnp.all(vec[:, max(D1, D2, C):] == 0.0))
    assert bool(jnp.all(vec[0:2, D1:] == 0.0)) and bool(jnp.all(vec[2:4, D2:] == 0.0))
    assert bool(jnp.all(w12[1, D2:, :] == 0.0))
    assert bool(jnp.all(w12[0, D1:, :] == 0.0))

    return {"w0": w0, "w12": w12, "vec": vec}


def mlp_forward(x, packed, n_classes, slice_output=True):
    """x: (G, B, D0) or (B, D0) f32.  packed: output of prepare_packed_params.

    One pallas_call processes all G independent batches; weights stay
    VMEM-resident across grid steps (constant index_maps).  Set
    slice_output=False if the consumer can take the padded (.., P) output
    (saves one extra XLA slice dispatch).
    """
    squeeze = (x.ndim == 2)
    if squeeze:
        x = x[None]
    G, B, D0 = x.shape
    w0, w12, vec = packed["w0"], packed["w12"], packed["vec"]
    P = w0.shape[1]

    flops = G * (2 * B * (D0 * P + 2 * P * P) + 2 * D0 * P)
    transcendentals = G * (B * P + 2 * P)
    bytes_accessed = int(x.size * 4 + w0.size * 4 + w12.size * 4
                         + vec.size * 4 + G * B * P * 4)
    cost = pl.CostEstimate(flops=flops, transcendentals=transcendentals,
                           bytes_accessed=bytes_accessed)

    out_padded = pl.pallas_call(
        mlp_kernel,
        out_shape=jax.ShapeDtypeStruct((G, B, P), jnp.float32),
        grid=(G,),
        in_specs=[
            pl.BlockSpec((None, B, D0), lambda g: (g, 0, 0)),   # per-step batch
            pl.BlockSpec((D0, P), lambda g: (0, 0)),            # resident weights
            pl.BlockSpec((2, P, P), lambda g: (0, 0, 0)),        # resident weights
            pl.BlockSpec((5, P), lambda g: (0, 0)),              # resident vectors
        ],
        out_specs=pl.BlockSpec((None, B, P), lambda g: (g, 0, 0)),
        compiler_params=pltpu.CompilerParams(
            dimension_semantics=("parallel",)),                  # v7x dual-TC
        cost_estimate=cost,
    )(x, w0, w12, vec)

    out = out_padded[..., :n_classes] if slice_output else out_padded
    if squeeze:
        out = out[0]
    return out


def init_params(key, network_shape, n_classes):
    """Deterministic synthetic parameters (PyTorch-style init, unpadded)."""
    dims = list(network_shape)
    keys = jax.random.split(key, 6)
    p = {}

    def linear(kw, kb, fan_in, fan_out):
        bound = 1.0 / jnp.sqrt(fan_in)
        w = jax.random.uniform(kw, (fan_in, fan_out), jnp.float32, -bound, bound)
        b = jax.random.uniform(kb, (1, fan_out), jnp.float32, -bound, bound)
        return w, b

    p["w0"], p["b0"] = linear(keys[0], keys[1], dims[0], dims[1])
    p["w1"], p["b1"] = linear(keys[2], keys[3], dims[1], dims[2])
    p["w2"], p["b2"] = linear(keys[4], keys[5], dims[2], n_classes)
    # BatchNorm1d default init: gamma=1, beta=0
    p["g0"] = jnp.ones((1, dims[1]), jnp.float32)
    p["be0"] = jnp.zeros((1, dims[1]), jnp.float32)
    p["g1"] = jnp.ones((1, dims[2]), jnp.float32)
    p["be1"] = jnp.zeros((1, dims[2]), jnp.float32)
    return p


def mlp_reference(x, p):
    """Pure-JAX reference with the ORIGINAL (un-optimized) math, incl. biases."""
    def bn(h, g, b):
        mu = jnp.mean(h, axis=0, keepdims=True)
        var = jnp.mean((h - mu) ** 2, axis=0, keepdims=True)
        return (h - mu) * jax.lax.rsqrt(var + BN_EPS) * g + b

    h = x @ p["w0"] + p["b0"]
    h = jnp.maximum(bn(h, p["g0"], p["be0"]), 0.0)
    h = h @ p["w1"] + p["b1"]
    h = jax.nn.sigmoid(bn(h, p["g1"], p["be1"]))
    return h @ p["w2"] + p["b2"]


if __name__ == "__main__":
    network_shape = [32, 16, 8]   # MLP(network_shape=[32,16,8], n_classes=4)
    n_classes = 4
    batch = 8                     # rows per BatchNorm batch
    groups = 4                    # independent batches amortized in one call

    key = jax.random.PRNGKey(0)
    kx, kp = jax.random.split(key)
    x = jax.random.normal(kx, (groups, batch, network_shape[0]), jnp.float32)
    params = init_params(kp, network_shape, n_classes)
    packed = prepare_packed_params(params)

    out = mlp_forward(x, packed, n_classes)
    out = jax.block_until_ready(out)

    ref = jnp.stack([mlp_reference(x[g], params) for g in range(groups)])
    assert out.shape == (groups, batch, n_classes)
    assert jnp.allclose(out, ref, atol=1e-4, rtol=1e-4), "mismatch vs reference"

    print("KERNEL_OK")
</pallas_src>

<mosaic_0001>
module attributes {stable_mosaic.version = 11 : i64} {
  func.func @mlp_kernel(%arg0: i32, %arg1: memref<1x8x32xf32, #tpu.memory_space<vmem>>, %arg2: memref<32x128xf32, #tpu.memory_space<vmem>>, %arg3: memref<2x128x128xf32, #tpu.memory_space<vmem>>, %arg4: memref<5x128xf32, #tpu.memory_space<vmem>>, %arg5: memref<1x8x128xf32, #tpu.memory_space<vmem>>) attributes {dimension_semantics = [#tpu.dimension_semantics<parallel>], iteration_bounds = array<i64: 4>, scalar_prefetch = 0 : i64, scratch_operands = 0 : i64, tpu.core_type = #tpu.core_type<tc>, window_params = [{transform_indices = @transform_0, window_bounds = array<i64: 1, 8, 32>}, {pipeline_mode = #tpu.pipeline_mode<synchronous>, transform_indices = @transform_1, window_bounds = array<i64: 32, 128>}, {pipeline_mode = #tpu.pipeline_mode<synchronous>, transform_indices = @transform_2, window_bounds = array<i64: 2, 128, 128>}, {pipeline_mode = #tpu.pipeline_mode<synchronous>, transform_indices = @transform_3, window_bounds = array<i64: 5, 128>}, {transform_indices = @transform_4, window_bounds = array<i64: 1, 8, 128>}]} {
    %c0 = arith.constant 0 : index
    %c0_0 = arith.constant 0 : index
    %c0_1 = arith.constant 0 : index
    %0 = vector.load %arg1[%c0, %c0_0, %c0_1] : memref<1x8x32xf32, #tpu.memory_space<vmem>>, vector<1x8x32xf32>
    %1 = vector.shape_cast %0 : vector<1x8x32xf32> to vector<8x32xf32>
    %c0_2 = arith.constant 0 : index
    %c0_3 = arith.constant 0 : index
    %2 = vector.load %arg2[%c0_2, %c0_3] : memref<32x128xf32, #tpu.memory_space<vmem>>, vector<32x128xf32>
    %c0_4 = arith.constant 0 : index
    %c0_5 = arith.constant 0 : index
    %3 = vector.load %arg4[%c0_4, %c0_5] : memref<5x128xf32, #tpu.memory_space<vmem>>, vector<1x128xf32>
    %c1 = arith.constant 1 : index
    %c0_6 = arith.constant 0 : index
    %4 = vector.load %arg4[%c1, %c0_6] : memref<5x128xf32, #tpu.memory_space<vmem>>, vector<1x128xf32>
    %c2 = arith.constant 2 : index
    %c0_7 = arith.constant 0 : index
    %5 = vector.load %arg4[%c2, %c0_7] : memref<5x128xf32, #tpu.memory_space<vmem>>, vector<1x128xf32>
    %c3 = arith.constant 3 : index
    %c0_8 = arith.constant 0 : index
    %6 = vector.load %arg4[%c3, %c0_8] : memref<5x128xf32, #tpu.memory_space<vmem>>, vector<1x128xf32>
    %c4 = arith.constant 4 : index
    %c0_9 = arith.constant 0 : index
    %7 = vector.load %arg4[%c4, %c0_9] : memref<5x128xf32, #tpu.memory_space<vmem>>, vector<1x128xf32>
    %cst = arith.constant dense<0.000000e+00> : vector<8x128xf32>
    %8 = tpu.matmul %1, %2, %cst {dimension_numbers = #tpu.dot_dimension_numbers<[1], [0], [0], [1], [0, 0, 1, 1], [], []>} : vector<8x32xf32>, vector<32x128xf32>, vector<8x128xf32> -> vector<8x128xf32>
    %cst_10 = arith.constant dense<0.000000e+00> : vector<32xf32>
    %9 = vector.multi_reduction <add>, %1, %cst_10 [0] : vector<8x32xf32> to vector<32xf32>
    %10 = vector.shape_cast %9 : vector<32xf32> to vector<1x32xf32>
    %cst_11 = arith.constant 8.000000e+00 : f32
    %11 = vector.broadcast %cst_11 : f32 to vector<1x32xf32>
    %12 = arith.divf %10, %11 : vector<1x32xf32>
    %cst_12 = arith.constant dense<0.000000e+00> : vector<1x128xf32>
    %13 = tpu.matmul %12, %2, %cst_12 {dimension_numbers = #tpu.dot_dimension_numbers<[1], [0], [0], [1], [0, 0, 1, 1], [], []>} : vector<1x32xf32>, vector<32x128xf32>, vector<1x128xf32> -> vector<1x128xf32>
    %14 = vector.broadcast %13 : vector<1x128xf32> to vector<8x128xf32>
    %15 = arith.subf %8, %14 : vector<8x128xf32>
    %16 = arith.mulf %15, %15 : vector<8x128xf32>
    %cst_13 = arith.constant dense<0.000000e+00> : vector<128xf32>
    %17 = vector.multi_reduction <add>, %16, %cst_13 [0] : vector<8x128xf32> to vector<128xf32>
    %18 = vector.shape_cast %17 : vector<128xf32> to vector<1x128xf32>
    %cst_14 = arith.constant 8.000000e+00 : f32
    %19 = vector.broadcast %cst_14 : f32 to vector<1x128xf32>
    %20 = arith.divf %18, %19 : vector<1x128xf32>
    %cst_15 = arith.constant 9.99999974E-6 : f32
    %21 = vector.broadcast %cst_15 : f32 to vector<1x128xf32>
    %22 = arith.addf %20, %21 : vector<1x128xf32>
    %23 = math.rsqrt %22 : vector<1x128xf32>
    %24 = arith.mulf %23, %3 : vector<1x128xf32>
    %25 = vector.broadcast %24 : vector<1x128xf32> to vector<8x128xf32>
    %26 = arith.mulf %15, %25 : vector<8x128xf32>
    %27 = vector.broadcast %4 : vector<1x128xf32> to vector<8x128xf32>
    %28 = arith.addf %26, %27 : vector<8x128xf32>
    %cst_16 = arith.constant 0.000000e+00 : f32
    %29 = vector.broadcast %cst_16 : f32 to vector<8x128xf32>
    %30 = arith.maximumf %28, %29 : vector<8x128xf32>
    %c0_17 = arith.constant 0 : index
    %c0_18 = arith.constant 0 : index
    %c0_19 = arith.constant 0 : index
    %31 = vector.load %arg3[%c0_17, %c0_18, %c0_19] : memref<2x128x128xf32, #tpu.memory_space<vmem>>, vector<1x128x128xf32>
    %32 = vector.shape_cast %31 : vector<1x128x128xf32> to vector<128x128xf32>
    %cst_20 = arith.constant dense<0.000000e+00> : vector<8x128xf32>
    %33 = tpu.matmul %30, %32, %cst_20 {dimension_numbers = #tpu.dot_dimension_numbers<[1], [0], [0], [1], [0, 0, 1, 1], [], []>} : vector<8x128xf32>, vector<128x128xf32>, vector<8x128xf32> -> vector<8x128xf32>
    %cst_21 = arith.constant dense<0.000000e+00> : vector<128xf32>
    %34 = vector.multi_reduction <add>, %33, %cst_21 [0] : vector<8x128xf32> to vector<128xf32>
    %35 = vector.shape_cast %34 : vector<128xf32> to vector<1x128xf32>
    %cst_22 = arith.constant 8.000000e+00 : f32
    %36 = vector.broadcast %cst_22 : f32 to vector<1x128xf32>
    %37 = arith.divf %35, %36 : vector<1x128xf32>
    %38 = vector.broadcast %37 : vector<1x128xf32> to vector<8x128xf32>
    %39 = arith.subf %33, %38 : vector<8x128xf32>
    %40 = arith.mulf %39, %39 : vector<8x128xf32>
    %cst_23 = arith.constant dense<0.000000e+00> : vector<128xf32>
    %41 = vector.multi_reduction <add>, %40, %cst_23 [0] : vector<8x128xf32> to vector<128xf32>
    %42 = vector.shape_cast %41 : vector<128xf32> to vector<1x128xf32>
    %cst_24 = arith.constant 8.000000e+00 : f32
    %43 = vector.broadcast %cst_24 : f32 to vector<1x128xf32>
    %44 = arith.divf %42, %43 : vector<1x128xf32>
    %cst_25 = arith.constant 9.99999974E-6 : f32
    %45 = vector.broadcast %cst_25 : f32 to vector<1x128xf32>
    %46 = arith.addf %44, %45 : vector<1x128xf32>
    %47 = math.rsqrt %46 : vector<1x128xf32>
    %48 = arith.mulf %47, %5 : vector<1x128xf32>
    %49 = vector.broadcast %48 : vector<1x128xf32> to vector<8x128xf32>
    %50 = arith.mulf %39, %49 : vector<8x128xf32>
    %51 = vector.broadcast %6 : vector<1x128xf32> to vector<8x128xf32>
    %52 = arith.addf %50, %51 : vector<8x128xf32>
    %53 = arith.negf %52 : vector<8x128xf32>
    %54 = math.exp %53 : vector<8x128xf32>
    %cst_26 = arith.constant 1.000000e+00 : f32
    %55 = vector.broadcast %cst_26 : f32 to vector<8x128xf32>
    %56 = arith.addf %55, %54 : vector<8x128xf32>
    %57 = arith.divf %55, %56 : vector<8x128xf32>
    %c1_27 = arith.constant 1 : index
    %c0_28 = arith.constant 0 : index
    %c0_29 = arith.constant 0 : index
    %58 = vector.load %arg3[%c1_27, %c0_28, %c0_29] : memref<2x128x128xf32, #tpu.memory_space<vmem>>, vector<1x128x128xf32>
    %59 = vector.shape_cast %58 : vector<1x128x128xf32> to vector<128x128xf32>
    %cst_30 = arith.constant dense<0.000000e+00> : vector<8x128xf32>
    %60 = tpu.matmul %57, %59, %cst_30 {dimension_numbers = #tpu.dot_dimension_numbers<[1], [0], [0], [1], [0, 0, 1, 1], [], []>} : vector<8x128xf32>, vector<128x128xf32>, vector<8x128xf32> -> vector<8x128xf32>
    %61 = vector.broadcast %7 : vector<1x128xf32> to vector<8x128xf32>
    %62 = arith.addf %60, %61 : vector<8x128xf32>
    %c0_31 = arith.constant 0 : index
    %c0_32 = arith.constant 0 : index
    %c0_33 = arith.constant 0 : index
    %63 = vector.load %arg5[%c0_31, %c0_32, %c0_33] : memref<1x8x128xf32, #tpu.memory_space<vmem>>, vector<1x8x128xf32>
    %64 = vector.shape_cast %63 : vector<1x8x128xf32> to vector<8x128xf32>
    %65 = vector.shape_cast %62 : vector<8x128xf32> to vector<1x8x128xf32>
    tpu.vector_store %arg5[%c0_31, %c0_32, %c0_33], %65 {strides = array<i32>} : memref<1x8x128xf32, #tpu.memory_space<vmem>>, vector<1x8x128xf32>,
    return
  }
  func.func @transform_0(%arg0: i32) -> (i32, i32, i32) {
    %c0_i32 = arith.constant 0 : i32
    %c0_i32_0 = arith.constant 0 : i32
    %c0_i32_1 = arith.constant 0 : i32
    return %arg0, %c0_i32, %c0_i32_0 : i32, i32, i32
  }
  func.func @transform_1(%arg0: i32) -> (i32, i32) {
    %c0_i32 = arith.constant 0 : i32
    %c0_i32_0 = arith.constant 0 : i32
    %c0_i32_1 = arith.constant 0 : i32
    return %c0_i32, %c0_i32_0 : i32, i32
  }
  func.func @transform_2(%arg0: i32) -> (i32, i32, i32) {
    %c0_i32 = arith.constant 0 : i32
    %c0_i32_0 = arith.constant 0 : i32
    %c0_i32_1 = arith.constant 0 : i32
    %c0_i32_2 = arith.constant 0 : i32
    return %c0_i32, %c0_i32_0, %c0_i32_1 : i32, i32, i32
  }
  func.func @transform_3(%arg0: i32) -> (i32, i32) {
    %c0_i32 = arith.constant 0 : i32
    %c0_i32_0 = arith.constant 0 : i32
    %c0_i32_1 = arith.constant 0 : i32
    return %c0_i32, %c0_i32_0 : i32, i32
  }
  func.func @transform_4(%arg0: i32) -> (i32, i32, i32) {
    %c0_i32 = arith.constant 0 : i32
    %c0_i32_0 = arith.constant 0 : i32
    %c0_i32_1 = arith.constant 0 : i32
    return %arg0, %c0_i32, %c0_i32_0 : i32, i32, i32
  }
}

</mosaic_0001>

<bundles_post_ra>
// kernel: tpu_custom_call.1
= control target key start
LH: loop header
LB: loop body
LE: loop exit
PB: predicated region body
PF: predicated region fallthrough
CT: control target
= control target key end

     0   :  { %9 = vsyncpa [#allocation3], 0  ;;  %s1111_s0 = inlined_call_operand.hbm [shape: f32[4,8,32], index: 0, kind: input, shape index: {}]   ;;  %s1112_s1 = inlined_call_operand.hbm [shape: f32[32,128], index: 1, kind: input, shape index: {}]   ;;  %s1113_s2 = inlined_call_operand.hbm [shape: f32[2,128,128], index: 2, kind: input, shape index: {}]   ;;  %s1114_s3 = inlined_call_operand.hbm [shape: f32[5,128], index: 3, kind: input, shape index: {}]   ;;  %s1115_s4 = inlined_call_operand.hbm [shape: f32[4,8,128], index: 4, kind: output, shape index: {}]  }
   0x1   :  { %11 = vsyncpa [#allocation3 + $0x1], 0 }
   0x2   :  { %12 = vsyncpa [#allocation6], 0 }
   0x3   :  { %13 = vsyncpa [#allocation9], 0 }
   0x4   :  { %14 = vsyncpa [#allocation4], 0 }
   0x5   :  { %16 = vsyncpa [#allocation4 + $0x1], 0  ;;  %s944_s15 = smov 0   ;;  %s946_s16 = smov 0  }
   0x6   :  { %s948_s17 = smov 0   ;;  %s950_s18 = smov 0  }
   0x7 LB: > { %s153_s21 = sshll.u32 %s1112_s1, 4  ;;  %s968_s22 = sadd.s32 4294967295, %s911_s18   ;;  %s911_s18 = sphi %s950_s18, %s1125_s18   ;;  %s907_s17 = sphi %s948_s17, %s1124_s17   ;;  %s903_s16 = sphi %s946_s16, %s1123_s16   ;;  %s899_s15 = sphi %s944_s15, %s1122_s15   ;;  %s154_s21 = int_to_ptr.hbm [resolvable:$true] %s153_s21 }
   0x8   : > { %p604_p0 = scmp.ge.s32.totalorder %s911_s18, 1  ;;  %p43_p1 = scmp.eq.s32.totalorder %s968_s22, 0 }
   0x9   : > { %p142_p2 = scmp.lt.s32.totalorder %s911_s18, 5  ;;  %s913_s24 = smov [#allocation5]  }
   0xa   : > { %s155_s25 = sshll.u32 %s913_s24, 4  ;;  %s167_s28 = sshll.u32 %s1113_s2, 4  ;;  %s156_s25 = int_to_ptr.vmem [resolvable:$true] %s155_s25  ;;  %s168_s28 = int_to_ptr.hbm [resolvable:$true] %s167_s28 }
   0xb   : > { %p973_p3 = pnand %p604_p0, %p142_p2  ;;  %s182_s6 = sshll.u32 %s1114_s3, 4  ;;  %s183_s6 = int_to_ptr.hbm [resolvable:$true] %s182_s6 }
   0xc   : > { %s914_s7 = smov [#allocation7]   ;;  %s915_s9 = smov 128  }
   0xd   : > { %p640_p4 = pneg %p973_p3  ;;  %s169_s8 = sshll.u32 %s914_s7, 4  ;;  %s170_s8 = int_to_ptr.vmem [resolvable:$true] %s169_s8 }
   0xe   : > { %s916_s10 = smov 8   ;;  %s917_s11 = smov [#allocation8]  }
   0xf   : > { %p984_p5 = pnand %p640_p4, %p43_p1  ;;  %s184_s12 = sshll.u32 %s917_s11, 4  ;;  %s185_s12 = int_to_ptr.vmem [resolvable:$true] %s184_s12 }
  0x10   : > { %s603_s13 = sadd.s32 4294967294, %s911_s18   ;;  %s999_s14 = sadd.s32 1, %s911_s18  }
  0x11   : > { %643 = dma.hbm_to_vmem [thread:$0]  (!%p984_p5), %s154_s21, 512, %s156_s25, [#allocation6], %s915_s9, %s915_s9, %s916_s10  }
  0x12   : > { %646 = dma.hbm_to_vmem [thread:$0]  (!%p984_p5), %s168_s28, 4096, %s170_s8, [#allocation6], %s915_s9, %s915_s9, %s916_s10  }
  0x13   : > { %649 = dma.hbm_to_vmem [thread:$0]  (!%p984_p5), %s183_s6, 128, %s185_s12, [#allocation9]  }
  0x14   : > { %s29_s19 = sadd.s32 1, %s907_s17  ;;  %s26_s20 = ssub.s32 %s911_s18, %s999_s14 }
  0x15   : > { %p36_p6 = scmp.ne.s32.totalorder %s907_s17, %s903_s16  ;;  %p27_p7 = scmp.eq.s32.totalorder %s26_s20, 0 }
  0x16   : > { %p37_p8 = scmp.eq.s32.totalorder %s911_s18, 0  ;;  %p42_p9 = scmp.ne.s32.totalorder %s903_s16, %s899_s15 }
  0x17   : > { %p129_p10 = scmp.eq.s32.totalorder %s968_s22, 3  ;;  %p135_p13 = scmp.eq.s32.totalorder %s603_s13, 3 }
  0x18   : > { %s1011_s21 = scalar_select %p27_p7, %s907_s17, %s29_s19  }
  0x19   : > { %p1015_p11 = por %p43_p1, %p42_p9  ;;  %p1019_p12 = por %p129_p10, %p36_p6 }
  0x1a   : > { %p38_p0 = por %p37_p8, %p36_p6  ;;  %s195_s26 = sand.u32 1, %s907_s17  }
  0x1b   : > { %p1024_p2 = por %p135_p13, %p42_p9  ;;  %p661_p4 = scmp.lt.s32.totalorder %s911_s18, 4 }
  0x1c   : > { %s609_s28 = sshll.u32 %s195_s26, 3  ;;  %s610_s29 = sshll.u32 %s911_s18, 3 }
  0x1d   : > { %s203_s6 = scalar_lea.hbm %s1111_s0, %s610_s29  ;;  %s199_s8 = scalar_lea.vmem [#allocation2], %s609_s28 }
  0x1e   : > { %s205_s7 = sshll.u32 %s203_s6, 4  ;;  %s207_s9 = sshll.u32 %s199_s8, 4  ;;  %s206_s7 = int_to_ptr.hbm [resolvable:$true] %s205_s7  ;;  %s208_s9 = int_to_ptr.vmem [resolvable:$true] %s207_s9 }
  0x1f   : > { %p1033_p5 = pnand %p661_p4, %p38_p0  ;;  %s196_s11 = scalar_lea.sflag [#allocation3], %s195_s26 }
  0x20   : > { %s807_s12 = sshra.s32 %s206_s7, 4  ;;  %s814_s28 = scalar_lea.hbm %s1111_s0, 32  ;;  %s808_s12 = int_to_ptr.hbm [resolvable:$true] %s807_s12 }
  0x21   : > { %s809_s13 = scalar_lea.hbm %s808_s12, 8  ;;  %p811_p7 = pneg %p1033_p5 }
  0x22   : > { %p810_p6 = scmp.ne.s32.totalorder %s808_s12, %s809_s13  ;;  %p815_p10 = scmp.lt.s32.totalorder %s808_s12, %s1111_s0 }
  0x23   : > { %p816_p13 = scmp.lt.s32.totalorder %s814_s28, %s809_s13 }
  0x24   : > { %p812_p8 = pnand %p811_p7, %p810_p6 }
  0x25   : > { %p817_p0 = por %p816_p13, %p815_p10 }
  0x26   : > { %p813_p9 = pneg %p812_p8 }
  0x28   : > { %p818_p4 = pnand %p817_p0, %p813_p9 }
  0x2a   : > { %821 = shalt.err (!%p818_p4)
}
  0x2b   : > { %653 = dma.hbm_to_vmem [thread:$0]  (!%p1033_p5), %s206_s7, 128, %s208_s9, %s196_s11  }
  0x2c   : > { %216 = sbr.rel (%p973_p3) target bundleno = 606 (0x25e), region = 36  ;;  %s1050_s26 = sand.u32 (!%p973_p3), 1, %s903_s16  }
  0x2d   : > { %s612_s5 = sshll.u32 (!%p973_p3), %s1050_s26, 3  ;;  %s219_s6 = scalar_lea.sflag (!%p973_p3), [#allocation3], %s1050_s26 }
  0x2e   : > { %s222_s8 = scalar_lea.vmem (!%p973_p3), [#allocation2], %s612_s5 }
  0x31   : > { %882 = dma.done.wait (%p1015_p11), %s219_s6, 128  }
  0x32   : > { %884 = vsyncadd (%p1015_p11), %s219_s6, 4294967168 }
  0x33   : > { %886 = dma.done.wait (%p43_p1), [#allocation6], 4608  }
  0x34   : > { %888 = vsyncadd (%p43_p1), [#allocation6], 4294962688 }
  0x35   : > { %890 = dma.done.wait (%p43_p1), [#allocation9], 128  }
  0x36   : > { %892 = vsyncadd (%p43_p1), [#allocation9], 4294967168  ;;  %v918_v0 = vmov 8.0   ;;  %vm273_vm0 = vcmask 261120   ;;  %v267_v2 = vld [vmem:[#allocation5 + $0x18] sm:$0xff]  ;;  %v266_v3 = vld [vmem:[#allocation5 + $0x10] sm:$0xff] }
  0x37   : > { %707 = vrcp.f32 %v918_v0  ;;  %327 = vmatpush.msra.mxu1 %v267_v2  ;;  %289 = vmatpush.msra.mxu0 %v267_v2  ;;  %v263_v4 = vld [vmem:[%s222_s8] sm:$0xff]  ;;  %v265_v6 = vld [vmem:[#allocation5 + $0x8] sm:$0xff]  ;;  %v264_v10 = vld [vmem:[#allocation5] sm:$0xff]  ;;  %s621_s23 = sshll.u32 %s968_s22, 3  ;;  %s262_s10 = scalar_lea.vmem [#allocation10], %s612_s5 }
  0x38   : > { %v297_v7 = vsel %vm273_vm0, %v263_v4, 0.0  ;;  %v377_v20 = vld [vmem:[#allocation7 + $0x78] sm:$0xff]  ;;  %v376_v21 = vld [vmem:[#allocation7 + $0x70] sm:$0xff]  ;;  %v375_v22 = vld [vmem:[#allocation7 + $0x68] sm:$0xff]  ;;  %s499_s9 = scalar_lea.hbm %s1115_s4, %s621_s23  ;;  %s501_s11 = sshll.u32 %s262_s10, 4  ;;  %s502_s11 = int_to_ptr.vmem [resolvable:$true] %s501_s11 }
  0x39   : > { %328 = vmatpush.msra.mxu1 %v266_v3  ;;  %290 = vmatpush.msra.mxu0 %v266_v3  ;;  %v298_v8 = vrot.slane %v297_v7, 4  ;;  %v374_v23 = vld [vmem:[#allocation7 + $0x60] sm:$0xff]  ;;  %v373_v24 = vld [vmem:[#allocation7 + $0x58] sm:$0xff]  ;;  %v372_v25 = vld [vmem:[#allocation7 + $0x50] sm:$0xff]  ;;  %s503_s12 = sshll.u32 %s499_s9, 4  ;;  %s489_s13 = scalar_lea.sflag [#allocation4], %s1050_s26  ;;  %s504_s12 = int_to_ptr.hbm [resolvable:$true] %s503_s12 }
  0x3a   : > { %378 = vmatpush.msra.mxu2 %v377_v20  ;;  %v371_v26 = vld [vmem:[#allocation7 + $0x48] sm:$0xff]  ;;  %v370_v30 = vld [vmem:[#allocation7 + $0x40] sm:$0xff]  ;;  %v369_v32 = vld [vmem:[#allocation7 + $0x38] sm:$0xff]  ;;  %s851_s19 = sshra.s32 %s504_s12, 4  ;;  %s857_s29 = scalar_lea.hbm %s1115_s4, 32  ;;  %s852_s19 = int_to_ptr.hbm [resolvable:$true] %s851_s19 }
  0x3b   : > { %329 = vmatpush.msra.mxu1 %v265_v6  ;;  %291 = vmatpush.msra.mxu0 %v265_v6  ;;  %v299_v11 = vadd.f32 %v298_v8, %v297_v7  ;;  %v368_v34 = vld [vmem:[#allocation7 + $0x30] sm:$0xff]  ;;  %v367_v36 = vld [vmem:[#allocation7 + $0x28] sm:$0xff]  ;;  %v366_v38 = vld [vmem:[#allocation7 + $0x20] sm:$0xff]  ;;  %s853_s20 = scalar_lea.hbm %s852_s19, 8  ;;  %p858_p5 = scmp.lt.s32.totalorder %s852_s19, %s1115_s4 }
  0x3c   : > { %379 = vmatpush.msra.mxu2 %v376_v21  ;;  %v365_v40 = vld [vmem:[#allocation7 + $0x18] sm:$0xff]  ;;  %v364_v42 = vld [vmem:[#allocation7 + $0x10] sm:$0xff]  ;;  %v363_v43 = vld [vmem:[#allocation7 + $0x8] sm:$0xff]  ;;  %p854_p1 = scmp.ne.s32.totalorder %s852_s19, %s853_s20  ;;  %p859_p6 = scmp.lt.s32.totalorder %s857_s29, %s853_s20 }
  0x3d   : > { %v708_v1 = vpop.eup %707  ;;  %330 = vmatpush.msra.mxu1 %v264_v10  ;;  %v300_v13 = vrot.slane %v299_v11, 2  ;;  %292 = vmatpush.msra.mxu0 %v264_v10  ;;  %v362_v45 = vld [vmem:[#allocation7] sm:$0xff] }
  0x3e   : > { %v305_v5 = vmul.f32 8.0, %v708_v1  ;;  %617 = vmatmul.msk.f32.vlgmr.msra.gmra.mxu0 %vm273_vm0, %v263_v4  ;;  %vm309_vm1 = vweird.f32 %v708_v1  ;;  %380 = vmatpush.msra.mxu2 %v375_v22  ;;  %v268_v54 = vld [vmem:[#allocation8] sm:$0x1]  ;;  %v704_v59 = vld [vmem:[#allocation8 + $0x1] ss:$0 sm:$0xff]  ;;  %v461_v22 = vld [vmem:[#allocation7 + $0xd8] sm:$0xff]  ;;  %p855_p3 = pnand %p854_p1, %p1019_p12  ;;  %p860_p7 = por %p859_p6, %p858_p5 }
  0x3f   : > { %v301_v15 = vadd.f32 %v300_v13, %v299_v11  ;;  %v465_v13 = vld [vmem:[#allocation7 + $0xf8] sm:$0xff]  ;;  %v462_v20 = vld [vmem:[#allocation7 + $0xe0] sm:$0xff] }
  0x40   : > { %v306_v9 = vsub.f32 1.0, %v305_v5  ;;  %381 = vmatpush.msra.mxu2 %v374_v23  ;;  %467 = vmatpush.msra.mxu3 %v465_v13  ;;  %v460_v23 = vld [vmem:[#allocation7 + $0xd0] sm:$0xff]  ;;  %p856_p11 = pneg %p855_p3 }
  0x41   : > { %v302_v16 = vrot.slane %v301_v15, 1 }
  0x42   : > { %v307_v12 = vmul.f32 %v708_v1, %v306_v9  ;;  %382 = vmatpush.msra.mxu2 %v373_v24  ;;  %v459_v24 = vld [vmem:[#allocation7 + $0xc8] sm:$0xff]  ;;  %p861_p8 = pnand %p860_p7, %p856_p11 }
  0x43   : > { %v303_v18 = vadd.f32 %v302_v16, %v301_v15  ;;  %v464_v15 = vld [vmem:[#allocation7 + $0xf0] sm:$0xff] }
  0x44   : > { %v308_v14 = vadd.f32 %v708_v1, %v307_v12  ;;  %383 = vmatpush.msra.mxu2 %v372_v25  ;;  %468 = vmatpush.msra.mxu3 %v464_v15  ;;  %v458_v25 = vld [vmem:[#allocation7 + $0xc0] sm:$0xff] }
  0x46   : > { %v1070_v17 = vsel %vm309_vm1, %v708_v1, %v308_v14  ;;  %384 = vmatpush.msra.mxu2 %v371_v26  ;;  %v457_v26 = vld [vmem:[#allocation7 + $0xb8] sm:$0xff] }
  0x47   : > { %v311_v19 = vmul.f32 %v1070_v17, %v303_v18  ;;  %v463_v18 = vld [vmem:[#allocation7 + $0xe8] sm:$0xff] }
  0x48   : > { %385 = vmatpush.msra.mxu2 %v370_v30  ;;  %469 = vmatpush.msra.mxu3 %v463_v18  ;;  %v455_v30 = vld [vmem:[#allocation7 + $0xa8] sm:$0xff] }
  0x49   : > { %618 = vmatmul.msk.f32.vlgmr.msra.gmra.mxu1 %vm273_vm0, %v311_v19 }
  0x4a   : > { %386 = vmatpush.msra.mxu2 %v369_v32  ;;  %470 = vmatpush.msra.mxu3 %v462_v20 }
  0x4c   : > { %387 = vmatpush.msra.mxu2 %v368_v34  ;;  %471 = vmatpush.msra.mxu3 %v461_v22 }
  0x4e   : > { %388 = vmatpush.msra.mxu2 %v367_v36  ;;  %472 = vmatpush.msra.mxu3 %v460_v23  ;;  %v270_v36 = vld [vmem:[#allocation8 + $0x2] sm:$0x1] }
  0x50   : > { %389 = vmatpush.msra.mxu2 %v366_v38  ;;  %473 = vmatpush.msra.mxu3 %v459_v24  ;;  %v451_v38 = vld [vmem:[#allocation7 + $0x88] sm:$0xff] }
  0x52   : > { %390 = vmatpush.msra.mxu2 %v365_v40  ;;  %474 = vmatpush.msra.mxu3 %v458_v25 }
  0x54   : > { %391 = vmatpush.msra.mxu2 %v364_v42  ;;  %475 = vmatpush.msra.mxu3 %v457_v26 }
  0x56   : > { %392 = vmatpush.msra.mxu2 %v363_v43  ;;  %v705_v43 = vld [vmem:[#allocation8 + $0x3] ss:$0 sm:$0xff] }
  0x58   : > { %393 = vmatpush.msra.mxu2 %v362_v45 }
  0xbb   : > { %v294_v28 = vpop.f32.mrf.mxu0 }
  0xc6   : > { %v332_v27 = vpop.f32.mrf.mxu1 }
  0xc7   : > { %v335_v29 = vperm.slane %v332_v27, 0 }
  0xc9   : > { %v336_v31 = vsub.f32 %v294_v28, %v335_v29  ;;  %v456_v28 = vld [vmem:[#allocation7 + $0xb0] sm:$0xff] }
  0xca   : > { %476 = vmatpush.msra.mxu3 %v456_v28 }
  0xcb   : > { %v337_v33 = vmul.f32 %v336_v31, %v336_v31 }
  0xcc   : > { %477 = vmatpush.msra.mxu3 %v455_v30 }
  0xcd   : > { %v338_v35 = vrot.slane %v337_v33, 4 }
  0xcf   : > { %v339_v37 = vadd.f32 %v338_v35, %v337_v33  ;;  %v453_v33 = vld [vmem:[#allocation7 + $0x98] sm:$0xff]  ;;  %v452_v35 = vld [vmem:[#allocation7 + $0x90] sm:$0xff] }
  0xd1   : > { %v340_v39 = vrot.slane %v339_v37, 2 }
  0xd3   : > { %v341_v41 = vadd.f32 %v340_v39, %v339_v37 }
  0xd5   : > { %v342_v44 = vrot.slane %v341_v41, 1 }
  0xd7   : > { %v343_v46 = vadd.f32 %v342_v44, %v341_v41  ;;  %v450_v41 = vld [vmem:[#allocation7 + $0x80] sm:$0xff] }
  0xd9   : > { %v344_v47 = vmul.f32 %v343_v46, %v1070_v17 }
  0xdb   : > { %v345_v48 = vadd.f32 1e-05, %v344_v47 }
  0xdd   : > { %709 = vrsqrt.f32 %v345_v48  ;;  %vm352_vm3 = vweird.f32 %v345_v48 }
  0xe3   : > { %v710_v49 = vpop.eup %709 }
  0xe4   : > { %v347_v50 = vmul.f32 %v710_v49, %v345_v48  ;;  %vm353_vm2 = vweird.f32 %v710_v49 }
  0xe5   : > { %vm354_vm4 = vmor %vm352_vm3, %vm353_vm2 }
  0xe6   : > { %v348_v51 = vmul.f32 %v710_v49, %v347_v50 }
  0xe8   : > { %v349_v52 = vmul.f32 0.5, %v348_v51 }
  0xea   : > { %v350_v53 = vsub.f32 1.5, %v349_v52 }
  0xec   : > { %v351_v55 = vmul.f32 %v710_v49, %v350_v53 }
  0xee   : > { %v355_v56 = vsel %vm354_vm4, %v710_v49, %v351_v55 }
  0xef   : > { %v356_v57 = vmul.f32 %v355_v56, %v268_v54 }
  0xf1   : > { %v357_v58 = vperm.slane %v356_v57, 0 }
  0xf3   : > { %v358_v60 = vmul.f32 %v357_v58, %v336_v31 }
  0xf5   : > { %v360_v61 = vadd.f32 %v704_v59, %v358_v60  ;;  %v706_v59 = vld [vmem:[#allocation8 + $0x4] ss:$0 sm:$0xff] }
  0xf7   : > { %v361_v62 = vmax.f32 %v360_v61, 0.0 }
  0xf9   : > { %394 = vmatmul.f32.vlgmr.msra.gmra.mxu2 %v361_v62 }
 0x17c   : > { %v395_v63 = vpop.f32.mrf.mxu2 }
 0x17d   : > { %v398_v0 = vrot.slane %v395_v63, 4 }
 0x17f   : > { %v399_v1 = vadd.f32 %v398_v0, %v395_v63 }
 0x181   : > { %v400_v2 = vrot.slane %v399_v1, 2 }
 0x183   : > { %v401_v3 = vadd.f32 %v400_v2, %v399_v1 }
 0x185   : > { %v402_v4 = vrot.slane %v401_v3, 1 }
 0x187   : > { %v403_v5 = vadd.f32 %v402_v4, %v401_v3 }
 0x189   : > { %v404_v6 = vmul.f32 %v403_v5, %v1070_v17 }
 0x18b   : > { %v405_v7 = vsub.f32 %v395_v63, %v404_v6 }
 0x18d   : > { %v406_v8 = vmul.f32 %v405_v7, %v405_v7 }
 0x18f   : > { %v407_v9 = vrot.slane %v406_v8, 4 }
 0x191   : > { %v408_v10 = vadd.f32 %v407_v9, %v406_v8 }
 0x193   : > { %v409_v11 = vrot.slane %v408_v10, 2 }
 0x195   : > { %v410_v12 = vadd.f32 %v409_v11, %v408_v10 }
 0x197   : > { %v411_v14 = vrot.slane %v410_v12, 1 }
 0x199   : > { %v412_v16 = vadd.f32 %v411_v14, %v410_v12 }
 0x19b   : > { %v413_v19 = vmul.f32 %v412_v16, %v1070_v17  ;;  %v454_v17 = vld [vmem:[#allocation7 + $0xa0] sm:$0xff] }
 0x19c   : > { %478 = vmatpush.msra.mxu3 %v454_v17 }
 0x19d   : > { %v414_v21 = vadd.f32 1e-05, %v413_v19 }
 0x19e   : > { %479 = vmatpush.msra.mxu3 %v453_v33 }
 0x19f   : > { %711 = vrsqrt.f32 %v414_v21  ;;  %vm421_vm6 = vweird.f32 %v414_v21 }
 0x1a0   : > { %480 = vmatpush.msra.mxu3 %v452_v35 }
 0x1a2   : > { %481 = vmatpush.msra.mxu3 %v451_v38 }
 0x1a4   : > { %482 = vmatpush.msra.mxu3 %v450_v41 }
 0x1a5   : > { %v712_v27 = vpop.eup %711 }
 0x1a6   : > { %v416_v29 = vmul.f32 %v712_v27, %v414_v21  ;;  %vm422_vm5 = vweird.f32 %v712_v27 }
 0x1a7   : > { %vm423_vm7 = vmor %vm421_vm6, %vm422_vm5 }
 0x1a8   : > { %v417_v31 = vmul.f32 %v712_v27, %v416_v29 }
 0x1aa   : > { %v418_v32 = vmul.f32 0.5, %v417_v31 }
 0x1ac   : > { %v419_v34 = vsub.f32 1.5, %v418_v32 }
 0x1ae   : > { %v420_v37 = vmul.f32 %v712_v27, %v419_v34 }
 0x1b0   : > { %v424_v39 = vsel %vm423_vm7, %v712_v27, %v420_v37 }
 0x1b1   : > { %v425_v40 = vmul.f32 %v424_v39, %v270_v36 }
 0x1b3   : > { %v426_v42 = vperm.slane %v425_v40, 0 }
 0x1b5   : > { %v427_v44 = vmul.f32 %v426_v42, %v405_v7 }
 0x1b7   : > { %v429_v45 = vadd.f32 %v705_v43, %v427_v44 }
 0x1b9   : > { %v619_v46 = vmul.f32 -1.442695, %v429_v45 }
 0x1bb   : > { %713 = vpow2.f32 %v619_v46 }
 0x1c1   : > { %v714_v47 = vpop.eup %713 }
 0x1c2   : > { %v433_v48 = vadd.f32 1.0, %v714_v47 }
 0x1c4   : > { %715 = vrcp.f32 %v433_v48  ;;  %v445_v52 = vand.u32 2147483648, %v433_v48  ;;  %v443_v54 = vand.u32 2147483647, %v433_v48  ;;  %vm439_vm9 = vweird.f32 %v433_v48 }
 0x1c6   : > { %v446_v56 = vor.u32 1.1754944e-38, %v445_v52  ;;  %vm444_vm11 = vcmp.eq.f32.partialorder %v443_v54, 8.507059e+37 }
 0x1ca   : > { %v716_v49 = vpop.eup %715 }
 0x1cb   : > { %v435_v50 = vmul.f32 %v716_v49, %v433_v48  ;;  %vm440_vm8 = vweird.f32 %v716_v49 }
 0x1cc   : > { %vm441_vm10 = vmor %vm439_vm9, %vm440_vm8 }
 0x1cd   : > { %v436_v51 = vsub.f32 1.0, %v435_v50 }
 0x1cf   : > { %v437_v53 = vmul.f32 %v716_v49, %v436_v51 }
 0x1d1   : > { %v438_v55 = vadd.f32 %v716_v49, %v437_v53 }
 0x1d3   : > { %v442_v57 = vsel %vm441_vm10, %v716_v49, %v438_v55 }
 0x1d4   : > { %v447_v58 = vsel %vm444_vm11, %v446_v56, %v442_v57 }
 0x1d5   : > { %483 = vmatmul.f32.vlgmr.msra.gmra.mxu3 %v447_v58 }
 0x258   : > { %v484_v60 = vpop.f32.mrf.mxu3 }
 0x259   : > { %v485_v61 = vadd.f32 %v706_v59, %v484_v60 }
 0x25b   : > { %487 = vst [vmem:[%s262_s10] sm:$0xff] %v485_v61 }
 0x25c   : > { %864 = shalt.err (!%p861_p8)
}
 0x25d   : > { %638 = dma.vmem_to_hbm [thread:$0]  (%p1019_p12), %s502_s11, 128, %s504_s12, %s489_s13  }
 0x25e PF: > { %p665_p9 = scmp.ge.s32.totalorder %s911_s18, 2  ;;  %s515_s26 = sand.u32 1, %s899_s15  }
 0x25f   : > { %s516_s6 = scalar_lea.sflag [#allocation4], %s515_s26 }
 0x260   : > { %p655_p10 = pnand %p665_p9, %p1024_p2 }
 0x262   : > { %p656_p13 = pneg %p655_p10 }
 0x264   : > { %894 = dma.done.wait (%p656_p13), %s516_s6, 128  }
 0x265   : > { %896 = vsyncadd (%p656_p13), %s516_s6, 4294967168  ;;  %p19_p0 = scmp.ge.s32.totalorder %s999_s14, 6   ;;  %s1122_s15 = smov %s903_s16 }
 0x266   : > { %s1123_s16 = smov %s907_s17  ;;  %s1124_s17 = smov %s1011_s21 }
 0x267   : > { %s1125_s18 = smov %s999_s14  ;;  %21 = sbr.rel (!%p19_p0) target bundleno = 7 (0x7), region = 94 }
 0x26c   :  { %522 = vsyncpa [#allocation3], 1 }
 0x26d   :  { %524 = vsyncpa [#allocation3 + $0x1], 1 }
 0x26e   :  { %525 = vsyncpa [#allocation6], 1 }
 0x26f   :  { %526 = vsyncpa [#allocation9], 1 }
 0x270   :  { %527 = vsyncpa [#allocation4], 1 }
 0x271   :  { %529 = vsyncpa [#allocation4 + $0x1], 1 }

</bundles_post_ra>
